<compile_context>
chip_gen: v7x
topology: tpu7x:2x2x1
jax: 0.10.0
libtpu: 0.0.40
codegen_flags: <defaults>
</compile_context>

<pallas_src>
import functools

import jax
import jax.numpy as jnp
from jax.experimental import pallas as pl
from jax.experimental.pallas import tpu as pltpu

C_IN, C_OUT, KH, KW = 16, 32, 3, 3
PAD, OUT_PAD = 1, 1
LANE = 128


def convt_relu_kernel(x_ref, w_ref, b_ref, o_ref, *, w_pad, m_wide):
    # x_ref: (C_IN, s_pad)        bf16 -- flattened, zero-padded image (one batch element)
    # w_ref: (KH*KW, C_OUT, C_IN) bf16 -- direct-conv weights per kernel position
    # b_ref: (C_OUT, 1)           f32
    # o_ref: (C_OUT, m_wide)      f32  -- m_wide is a multiple of 128 (lane-dense stores)
    x = x_ref[...]                       # (C_IN, s_pad)
    w = w_ref[...]                       # (KH*KW, C_OUT, C_IN)

    acc = None
    for kh in range(KH):
        for kw in range(KW):
            off = kh * w_pad + kw                               # static offset
            xs = x[:, off:off + m_wide]                         # (C_IN, m_wide) bf16
            wk = w[kh * KW + kw]                                # (C_OUT, C_IN)  bf16
            p = jnp.dot(wk, xs, preferred_element_type=jnp.float32)
            acc = p if acc is None else acc + p

    acc = acc + b_ref[...]                                      # bias broadcast over lanes
    o_ref[...] = jnp.maximum(acc, 0.0).astype(o_ref.dtype)      # ReLU


def prepare_params(w_pt, bias):
    """One-time transform: ConvTranspose2d weight -> direct-conv per-tap matrices."""
    # w_pt: (C_IN, C_OUT, KH, KW) (PyTorch ConvTranspose2d layout). Flip spatially.
    w_flip = w_pt[:, :, ::-1, ::-1]                             # (Cin, Cout, kh, kw)
    w_k = jnp.transpose(w_flip, (2, 3, 1, 0))                   # (kh, kw, Cout, Cin)
    w_k = w_k.reshape(KH * KW, C_OUT, C_IN).astype(jnp.bfloat16)
    b2 = bias.reshape(C_OUT, 1).astype(jnp.float32)
    return w_k, b2


@jax.jit
def conv_transpose_relu(x_nchw, w_k, b2):
    """x_nchw: (N, C_IN, H, W); w_k: (KH*KW, C_OUT, C_IN) bf16; b2: (C_OUT, 1) f32."""
    N, Cin, H, W = x_nchw.shape
    assert Cin == C_IN
    # ConvTranspose2d output size (stride=1, dilation=1):
    H_out = H - 2 * PAD + (KH - 1) + OUT_PAD                    # = H + 1
    W_out = W - 2 * PAD + (KW - 1) + OUT_PAD                    # = W + 1

    pad_lo = KH - 1 - PAD                                       # 1
    pad_hi = KH - 1 - PAD + OUT_PAD                             # 2
    H_pad, W_pad = H + pad_lo + pad_hi, W + pad_lo + pad_hi

    m_valid = H_out * W_pad                                     # valid flat output columns
    m_wide = ((m_valid + LANE - 1) // LANE) * LANE              # lane-aligned output width
    s_need = (KH - 1) * W_pad + (KW - 1) + m_wide               # flat cols touched by shifts
    s_pad = ((s_need + LANE - 1) // LANE) * LANE                # lane-aligned input width

    # Cast to bf16 BEFORE padding (half the pad bytes), pad spatially (stays NCHW),
    # flatten spatial dims, pad flat tail with zeros to the lane-aligned width.
    x_bf = x_nchw.astype(jnp.bfloat16)
    x_sp = jnp.pad(x_bf, ((0, 0), (0, 0), (pad_lo, pad_hi), (pad_lo, pad_hi)))
    x_flat = x_sp.reshape(N, C_IN, H_pad * W_pad)
    x_flat = jnp.pad(x_flat, ((0, 0), (0, 0), (0, s_pad - H_pad * W_pad)))

    kernel = functools.partial(convt_relu_kernel, w_pad=W_pad, m_wide=m_wide)

    out = pl.pallas_call(
        kernel,
        out_shape=jax.ShapeDtypeStruct((N, C_OUT, m_wide), jnp.float32),
        grid=(N,),
        in_specs=[
            pl.BlockSpec((None, C_IN, s_pad), lambda n: (n, 0, 0)),
            pl.BlockSpec((KH * KW, C_OUT, C_IN), lambda n: (0, 0, 0)),
            pl.BlockSpec((C_OUT, 1), lambda n: (0, 0)),
        ],
        out_specs=pl.BlockSpec((None, C_OUT, m_wide), lambda n: (n, 0, 0)),
        compiler_params=pltpu.CompilerParams(
            dimension_semantics=("parallel",)),
    )(x_flat, w_k, b2)

    # Drop lane-padding columns and the (KW-1) junk columns per row; result is NCHW.
    out = out[:, :, :m_valid].reshape(N, C_OUT, H_out, W_pad)[:, :, :, :W_out]
    return out


def reference(x_nchw, w_pt, bias):
    # Same math in plain JAX f32 (sanity check): direct conv with flipped kernel,
    # asymmetric padding (1 top/left, 2 bottom/right).
    w_oihw = jnp.transpose(w_pt[:, :, ::-1, ::-1], (1, 0, 2, 3))   # (Cout, Cin, kh, kw)
    y = jax.lax.conv_general_dilated(
        x_nchw, w_oihw, window_strides=(1, 1),
        padding=((KH - 1 - PAD, KH - 1 - PAD + OUT_PAD),
                 (KW - 1 - PAD, KW - 1 - PAD + OUT_PAD)),
        dimension_numbers=("NCHW", "OIHW", "NCHW"))
    y = y + bias.reshape(1, -1, 1, 1)
    return jnp.maximum(y, 0.0)


if __name__ == "__main__":
    key = jax.random.PRNGKey(0)
    kx, kw, kb = jax.random.split(key, 3)

    # Small shapes consistent with the module: C_in=16, C_out=32, spatial=16, batch=2.
    N, H, W = 2, 16, 16
    x = jax.random.normal(kx, (N, C_IN, H, W), dtype=jnp.float32)

    # Deterministic parameter init (PyTorch-style uniform scale).
    fan = C_OUT * KH * KW
    bound = 1.0 / (fan ** 0.5)
    w_pt = jax.random.uniform(kw, (C_IN, C_OUT, KH, KW),
                              minval=-bound, maxval=bound, dtype=jnp.float32)
    bias = jax.random.uniform(kb, (C_OUT,),
                              minval=-bound, maxval=bound, dtype=jnp.float32)

    w_k, b2 = prepare_params(w_pt, bias)                 # hoisted out of the per-call path
    out = jax.block_until_ready(conv_transpose_relu(x, w_k, b2))
    ref = jax.block_until_ready(reference(x, w_pt, bias))

    assert out.shape == (N, C_OUT, H + 1, W + 1), out.shape
    assert jnp.allclose(out, ref, rtol=2e-2, atol=2e-2), "mismatch vs JAX reference"

    print("KERNEL_OK")
</pallas_src>

<mosaic_0001>
module attributes {stable_mosaic.version = 11 : i64} {
  func.func @convt_relu_kernel(%arg0: i32, %arg1: memref<1x16x512xbf16, #tpu.memory_space<vmem>>, %arg2: memref<9x32x16xbf16, #tpu.memory_space<vmem>>, %arg3: memref<32x1xf32, #tpu.memory_space<vmem>>, %arg4: memref<1x32x384xf32, #tpu.memory_space<vmem>>) attributes {dimension_semantics = [#tpu.dimension_semantics<parallel>], iteration_bounds = array<i64: 2>, scalar_prefetch = 0 : i64, scratch_operands = 0 : i64, tpu.core_type = #tpu.core_type<tc>, window_params = [{transform_indices = @transform_0, window_bounds = array<i64: 1, 16, 512>}, {pipeline_mode = #tpu.pipeline_mode<synchronous>, transform_indices = @transform_1, window_bounds = array<i64: 9, 32, 16>}, {pipeline_mode = #tpu.pipeline_mode<synchronous>, transform_indices = @transform_2, window_bounds = array<i64: 32, 1>}, {transform_indices = @transform_3, window_bounds = array<i64: 1, 32, 384>}]} {
    %c0 = arith.constant 0 : index
    %c0_0 = arith.constant 0 : index
    %c0_1 = arith.constant 0 : index
    %0 = vector.load %arg1[%c0, %c0_0, %c0_1] : memref<1x16x512xbf16, #tpu.memory_space<vmem>>, vector<1x16x512xbf16>
    %1 = vector.shape_cast %0 : vector<1x16x512xbf16> to vector<16x512xbf16>
    %c0_2 = arith.constant 0 : index
    %c0_3 = arith.constant 0 : index
    %c0_4 = arith.constant 0 : index
    %2 = vector.load %arg2[%c0_2, %c0_3, %c0_4] : memref<9x32x16xbf16, #tpu.memory_space<vmem>>, vector<9x32x16xbf16>
    %3 = vector.extract_strided_slice %1 {offsets = [0, 0], sizes = [16, 384], strides = [1, 1]} : vector<16x512xbf16> to vector<16x384xbf16>
    %4 = vector.extract_strided_slice %2 {offsets = [0, 0, 0], sizes = [1, 32, 16], strides = [1, 1, 1]} : vector<9x32x16xbf16> to vector<1x32x16xbf16>
    %5 = vector.shape_cast %4 : vector<1x32x16xbf16> to vector<32x16xbf16>
    %cst = arith.constant dense<0.000000e+00> : vector<32x384xf32>
    %6 = tpu.matmul %5, %3, %cst {dimension_numbers = #tpu.dot_dimension_numbers<[1], [0], [0], [1], [0, 0, 1, 1], [], []>} : vector<32x16xbf16>, vector<16x384xbf16>, vector<32x384xf32> -> vector<32x384xf32>
    %7 = vector.extract_strided_slice %1 {offsets = [0, 1], sizes = [16, 384], strides = [1, 1]} : vector<16x512xbf16> to vector<16x384xbf16>
    %8 = vector.extract_strided_slice %2 {offsets = [1, 0, 0], sizes = [1, 32, 16], strides = [1, 1, 1]} : vector<9x32x16xbf16> to vector<1x32x16xbf16>
    %9 = vector.shape_cast %8 : vector<1x32x16xbf16> to vector<32x16xbf16>
    %cst_5 = arith.constant dense<0.000000e+00> : vector<32x384xf32>
    %10 = tpu.matmul %9, %7, %cst_5 {dimension_numbers = #tpu.dot_dimension_numbers<[1], [0], [0], [1], [0, 0, 1, 1], [], []>} : vector<32x16xbf16>, vector<16x384xbf16>, vector<32x384xf32> -> vector<32x384xf32>
    %11 = arith.addf %6, %10 : vector<32x384xf32>
    %12 = vector.extract_strided_slice %1 {offsets = [0, 2], sizes = [16, 384], strides = [1, 1]} : vector<16x512xbf16> to vector<16x384xbf16>
    %13 = vector.extract_strided_slice %2 {offsets = [2, 0, 0], sizes = [1, 32, 16], strides = [1, 1, 1]} : vector<9x32x16xbf16> to vector<1x32x16xbf16>
    %14 = vector.shape_cast %13 : vector<1x32x16xbf16> to vector<32x16xbf16>
    %cst_6 = arith.constant dense<0.000000e+00> : vector<32x384xf32>
    %15 = tpu.matmul %14, %12, %cst_6 {dimension_numbers = #tpu.dot_dimension_numbers<[1], [0], [0], [1], [0, 0, 1, 1], [], []>} : vector<32x16xbf16>, vector<16x384xbf16>, vector<32x384xf32> -> vector<32x384xf32>
    %16 = arith.addf %11, %15 : vector<32x384xf32>
    %17 = vector.extract_strided_slice %1 {offsets = [0, 19], sizes = [16, 384], strides = [1, 1]} : vector<16x512xbf16> to vector<16x384xbf16>
    %18 = vector.extract_strided_slice %2 {offsets = [3, 0, 0], sizes = [1, 32, 16], strides = [1, 1, 1]} : vector<9x32x16xbf16> to vector<1x32x16xbf16>
    %19 = vector.shape_cast %18 : vector<1x32x16xbf16> to vector<32x16xbf16>
    %cst_7 = arith.constant dense<0.000000e+00> : vector<32x384xf32>
    %20 = tpu.matmul %19, %17, %cst_7 {dimension_numbers = #tpu.dot_dimension_numbers<[1], [0], [0], [1], [0, 0, 1, 1], [], []>} : vector<32x16xbf16>, vector<16x384xbf16>, vector<32x384xf32> -> vector<32x384xf32>
    %21 = arith.addf %16, %20 : vector<32x384xf32>
    %22 = vector.extract_strided_slice %1 {offsets = [0, 20], sizes = [16, 384], strides = [1, 1]} : vector<16x512xbf16> to vector<16x384xbf16>
    %23 = vector.extract_strided_slice %2 {offsets = [4, 0, 0], sizes = [1, 32, 16], strides = [1, 1, 1]} : vector<9x32x16xbf16> to vector<1x32x16xbf16>
    %24 = vector.shape_cast %23 : vector<1x32x16xbf16> to vector<32x16xbf16>
    %cst_8 = arith.constant dense<0.000000e+00> : vector<32x384xf32>
    %25 = tpu.matmul %24, %22, %cst_8 {dimension_numbers = #tpu.dot_dimension_numbers<[1], [0], [0], [1], [0, 0, 1, 1], [], []>} : vector<32x16xbf16>, vector<16x384xbf16>, vector<32x384xf32> -> vector<32x384xf32>
    %26 = arith.addf %21, %25 : vector<32x384xf32>
    %27 = vector.extract_strided_slice %1 {offsets = [0, 21], sizes = [16, 384], strides = [1, 1]} : vector<16x512xbf16> to vector<16x384xbf16>
    %28 = vector.extract_strided_slice %2 {offsets = [5, 0, 0], sizes = [1, 32, 16], strides = [1, 1, 1]} : vector<9x32x16xbf16> to vector<1x32x16xbf16>
    %29 = vector.shape_cast %28 : vector<1x32x16xbf16> to vector<32x16xbf16>
    %cst_9 = arith.constant dense<0.000000e+00> : vector<32x384xf32>
    %30 = tpu.matmul %29, %27, %cst_9 {dimension_numbers = #tpu.dot_dimension_numbers<[1], [0], [0], [1], [0, 0, 1, 1], [], []>} : vector<32x16xbf16>, vector<16x384xbf16>, vector<32x384xf32> -> vector<32x384xf32>
    %31 = arith.addf %26, %30 : vector<32x384xf32>
    %32 = vector.extract_strided_slice %1 {offsets = [0, 38], sizes = [16, 384], strides = [1, 1]} : vector<16x512xbf16> to vector<16x384xbf16>
    %33 = vector.extract_strided_slice %2 {offsets = [6, 0, 0], sizes = [1, 32, 16], strides = [1, 1, 1]} : vector<9x32x16xbf16> to vector<1x32x16xbf16>
    %34 = vector.shape_cast %33 : vector<1x32x16xbf16> to vector<32x16xbf16>
    %cst_10 = arith.constant dense<0.000000e+00> : vector<32x384xf32>
    %35 = tpu.matmul %34, %32, %cst_10 {dimension_numbers = #tpu.dot_dimension_numbers<[1], [0], [0], [1], [0, 0, 1, 1], [], []>} : vector<32x16xbf16>, vector<16x384xbf16>, vector<32x384xf32> -> vector<32x384xf32>
    %36 = arith.addf %31, %35 : vector<32x384xf32>
    %37 = vector.extract_strided_slice %1 {offsets = [0, 39], sizes = [16, 384], strides = [1, 1]} : vector<16x512xbf16> to vector<16x384xbf16>
    %38 = vector.extract_strided_slice %2 {offsets = [7, 0, 0], sizes = [1, 32, 16], strides = [1, 1, 1]} : vector<9x32x16xbf16> to vector<1x32x16xbf16>
    %39 = vector.shape_cast %38 : vector<1x32x16xbf16> to vector<32x16xbf16>
    %cst_11 = arith.constant dense<0.000000e+00> : vector<32x384xf32>
    %40 = tpu.matmul %39, %37, %cst_11 {dimension_numbers = #tpu.dot_dimension_numbers<[1], [0], [0], [1], [0, 0, 1, 1], [], []>} : vector<32x16xbf16>, vector<16x384xbf16>, vector<32x384xf32> -> vector<32x384xf32>
    %41 = arith.addf %36, %40 : vector<32x384xf32>
    %42 = vector.extract_strided_slice %1 {offsets = [0, 40], sizes = [16, 384], strides = [1, 1]} : vector<16x512xbf16> to vector<16x384xbf16>
    %43 = vector.extract_strided_slice %2 {offsets = [8, 0, 0], sizes = [1, 32, 16], strides = [1, 1, 1]} : vector<9x32x16xbf16> to vector<1x32x16xbf16>
    %44 = vector.shape_cast %43 : vector<1x32x16xbf16> to vector<32x16xbf16>
    %cst_12 = arith.constant dense<0.000000e+00> : vector<32x384xf32>
    %45 = tpu.matmul %44, %42, %cst_12 {dimension_numbers = #tpu.dot_dimension_numbers<[1], [0], [0], [1], [0, 0, 1, 1], [], []>} : vector<32x16xbf16>, vector<16x384xbf16>, vector<32x384xf32> -> vector<32x384xf32>
    %46 = arith.addf %41, %45 : vector<32x384xf32>
    %c0_13 = arith.constant 0 : index
    %c0_14 = arith.constant 0 : index
    %47 = vector.load %arg3[%c0_13, %c0_14] : memref<32x1xf32, #tpu.memory_space<vmem>>, vector<32x1xf32>
    %48 = vector.broadcast %47 : vector<32x1xf32> to vector<32x384xf32>
    %49 = arith.addf %46, %48 : vector<32x384xf32>
    %cst_15 = arith.constant 0.000000e+00 : f32
    %50 = vector.broadcast %cst_15 : f32 to vector<32x384xf32>
    %51 = arith.maximumf %49, %50 : vector<32x384xf32>
    %c0_16 = arith.constant 0 : index
    %c0_17 = arith.constant 0 : index
    %c0_18 = arith.constant 0 : index
    %52 = vector.load %arg4[%c0_16, %c0_17, %c0_18] : memref<1x32x384xf32, #tpu.memory_space<vmem>>, vector<1x32x384xf32>
    %53 = vector.shape_cast %52 : vector<1x32x384xf32> to vector<32x384xf32>
    %54 = vector.shape_cast %51 : vector<32x384xf32> to vector<1x32x384xf32>
    tpu.vector_store %arg4[%c0_16, %c0_17, %c0_18], %54 {strides = array<i32>} : memref<1x32x384xf32, #tpu.memory_space<vmem>>, vector<1x32x384xf32>,
    return
  }
  func.func @transform_0(%arg0: i32) -> (i32, i32, i32) {
    %c0_i32 = arith.constant 0 : i32
    %c0_i32_0 = arith.constant 0 : i32
    %c0_i32_1 = arith.constant 0 : i32
    return %arg0, %c0_i32, %c0_i32_0 : i32, i32, i32
  }
  func.func @transform_1(%arg0: i32) -> (i32, i32, i32) {
    %c0_i32 = arith.constant 0 : i32
    %c0_i32_0 = arith.constant 0 : i32
    %c0_i32_1 = arith.constant 0 : i32
    %c0_i32_2 = arith.constant 0 : i32
    return %c0_i32, %c0_i32_0, %c0_i32_1 : i32, i32, i32
  }
  func.func @transform_2(%arg0: i32) -> (i32, i32) {
    %c0_i32 = arith.constant 0 : i32
    %c0_i32_0 = arith.constant 0 : i32
    %c0_i32_1 = arith.constant 0 : i32
    return %c0_i32, %c0_i32_0 : i32, i32
  }
  func.func @transform_3(%arg0: i32) -> (i32, i32, i32) {
    %c0_i32 = arith.constant 0 : i32
    %c0_i32_0 = arith.constant 0 : i32
    %c0_i32_1 = arith.constant 0 : i32
    return %arg0, %c0_i32, %c0_i32_0 : i32, i32, i32
  }
}

</mosaic_0001>

<bundles_post_ra>
// kernel: conv_transpose_relu.1
= control target key start
LH: loop header
LB: loop body
LE: loop exit
PB: predicated region body
PF: predicated region fallthrough
CT: control target
= control target key end

     0   :  { %s1940_s12 = smov 0   ;;  %s2164_s0 = inlined_call_operand.vmem [shape: bf16[2,16,512], index: 0, kind: input, shape index: {}]   ;;  %s2165_s1 = inlined_call_operand.vmem [shape: bf16[9,32,16], index: 1, kind: input, shape index: {}]   ;;  %s2166_s2 = inlined_call_operand.vmem [shape: f32[32,1], index: 2, kind: input, shape index: {}]   ;;  %s2167_s3 = inlined_call_operand.vmem [shape: f32[2,32,384], index: 3, kind: output, shape index: {}]  }
   0x1 LB: > { %s1613_s13 = sadd.s32 4294967295, %s1909_s12   ;;  %p1617_p0 = scmp.ge.s32.totalorder %s1909_s12, 1  ;;  %s1909_s12 = sphi %s1940_s12, %s13_s12  }
   0x2   : > { %p137_p1 = scmp.lt.s32.totalorder %s1909_s12, 3 }
   0x4   : > { %p138_p2 = pnand %p1617_p0, %p137_p1 }
   0x5   : > { %p161_p3 = scmp.lt.s32.totalorder (!%p138_p2), %s1613_s13, 1  ;;  %v1911_v0 = vmov (!%p138_p2), 0   ;;  %s1912_s18 = smov (!%p138_p2), 127   ;;  %vm246_vm0 = vcmask (!%p138_p2), 1039360   ;;  %v1885_v11 = vld [vmem:[%s2165_s1 + $0x10] sm:$0xff] (!%p138_p2)   ;;  %vm501_vm1 = vcmask (!%p138_p2), 1031168  }
   0x6   : > { %141 = sbr.rel (%p138_p2) target bundleno = 485 (0x1e5), region = 32  ;;  %292 = vmatprep.mubr.bf16.mxu1 (!%p138_p2), %v1911_v0  ;;  %546 = vmatprep.mubr.bf16.mxu0 (!%p138_p2), %v1911_v0  ;;  %s1913_s19 = smov (!%p138_p2), 126   ;;  %v1498_v12 = vld [vmem:[%s2166_s2] sm:$0xff] (!%p138_p2)  ;;  %v1499_v13 = vld [vmem:[%s2166_s2 + $0x8] sm:$0xff] (!%p138_p2)  ;;  %vm253_vm2 = vcmask (!%p138_p2), 130048   ;;  %v1500_v18 = vld [vmem:[%s2166_s2 + $0x10] sm:$0xff] (!%p138_p2) }
   0x7   : > { %1877 = vset.pattern.permute.xlu0 (!%p138_p2), %v1911_v0  ;;  %1878 = vset.pattern.permute.xlu1 (!%p138_p2), %v1911_v0  ;;  %s1914_s20 = smov (!%p138_p2), 109   ;;  %s1915_s21 = smov (!%p138_p2), 108   ;;  %v1501_v19 = vld [vmem:[%s2166_s2 + $0x18] sm:$0xff] (!%p138_p2)  ;;  %v2011_v23 = vld [vmem:[%s2165_s1 + $0x20] sm:$0xff] (!%p138_p2)   ;;  %vm646_vm3 = vcmask (!%p138_p2), 891904   ;;  %vm791_vm4 = vcmask (!%p138_p2), 883712  }
   0x8   : > { %s1916_s22 = smov (!%p138_p2), 107   ;;  %s1917_s23 = smov (!%p138_p2), 90   ;;  %v1887_v24 = vld [vmem:[%s2165_s1 + $0x18] sm:$0xff] (!%p138_p2)   ;;  %v1888_v31 = vld [vmem:[%s2165_s1 + $0x28] sm:$0xff] (!%p138_p2)   ;;  %v1889_v36 = vld [vmem:[%s2165_s1 + $0x30] sm:$0xff] (!%p138_p2)   ;;  %vm936_vm5 = vcmask (!%p138_p2), 875520  }
   0x9   : > { %s1918_s24 = smov (!%p138_p2), 89   ;;  %s1919_s25 = smov (!%p138_p2), 88   ;;  %v1890_v37 = vld [vmem:[%s2165_s1] sm:$0xff] (!%p138_p2)   ;;  %v1891_v43 = vld [vmem:[%s2165_s1 + $0x38] sm:$0xff] (!%p138_p2)   ;;  %v1892_v44 = vld [vmem:[%s2165_s1 + $0x8] sm:$0xff] (!%p138_p2)   ;;  %vm1081_vm6 = vcmask (!%p138_p2), 736256  }
   0xa   : > { %v1893_v46 = vld [vmem:[%s2165_s1 + $0x40] sm:$0xff] (!%p138_p2)   ;;  %v1894_v53 = vld [vmem:[%s2165_s1 + $0x48] sm:$0xff] (!%p138_p2)   ;;  %v1895_v56 = vld [vmem:[%s2165_s1 + $0x50] sm:$0xff] (!%p138_p2)   ;;  %vm1226_vm7 = vcmask (!%p138_p2), 728064   ;;  %vm1371_vm8 = vcmask (!%p138_p2), 719872  }
   0xb   : > { %v1896_v62 = vld [vmem:[%s2165_s1 + $0x58] sm:$0xff] (!%p138_p2)  }
   0xd   : > { %s2169_s13 = smov (!%p161_p3, %s1613_s13), 1 }
   0xe   : > { %s1681_s14 = sshll.u32 %s2169_s13, 5 }
   0xf   : > { %s165_s17 = scalar_lea.vmem %s2164_s0, %s1681_s14 }
  0x10   : > { %v1958_v1 = vld [vmem:[%s165_s17 + $0x4] ss:$16 sps:$4 sm:$0xff]   ;;  %v1960_v2 = vld [vmem:[%s165_s17] ss:$16 sps:$4 sm:$0xff]   ;;  %v1962_v3 = vld [vmem:[%s165_s17 + $0x8] ss:$16 sps:$4 sm:$0xff]  }
  0x11   : > { %v1884_v4 = vld [vmem:[%s165_s17 + $0xc] ss:$16 sps:$4 sm:$0xff]   ;;  %240 = vrot.lane.b32.xlu0 %v1958_v1, %s1912_s18  ;;  %238 = vrot.lane.b32.xlu1 %v1960_v2, %s1912_s18 }
  0x15   : > { %242 = vrot.lane.b32.xlu0 %v1962_v3, %s1912_s18  ;;  %244 = vrot.lane.b32.xlu1 %v1884_v4, %s1912_s18 }
  0x19   : > { %495 = vrot.lane.b32.xlu0 %v1958_v1, %s1913_s19  ;;  %497 = vrot.lane.b32.xlu1 %v1962_v3, %s1913_s19 }
  0x1d   : > { %493 = vrot.lane.b32.xlu0 %v1960_v2, %s1913_s19  ;;  %640 = vrot.lane.b32.xlu1 %v1958_v1, %s1914_s20 }
  0x21   : > { %642 = vrot.lane.b32.xlu0 %v1962_v3, %s1914_s20  ;;  %638 = vrot.lane.b32.xlu1 %v1960_v2, %s1914_s20 }
  0x25   : > { %785 = vrot.lane.b32.xlu0 %v1958_v1, %s1915_s21  ;;  %787 = vrot.lane.b32.xlu1 %v1962_v3, %s1915_s21 }
  0x29   : > { %783 = vrot.lane.b32.xlu0 %v1960_v2, %s1915_s21  ;;  %499 = vrot.lane.b32.xlu1 %v1884_v4, %s1913_s19 }
  0x2d   : > { %644 = vrot.lane.b32.xlu0 %v1884_v4, %s1914_s20  ;;  %930 = vrot.lane.b32.xlu1 %v1958_v1, %s1916_s22  ;;  %s1859_s20 = smul.u32 96, %s2169_s13 }
  0x31   : > { %932 = vrot.lane.b32.xlu0 %v1962_v3, %s1916_s22  ;;  %928 = vrot.lane.b32.xlu1 %v1960_v2, %s1916_s22 }
  0x35   : > { %789 = vrot.lane.b32.xlu0 %v1884_v4, %s1915_s21  ;;  %1075 = vrot.lane.b32.xlu1 %v1958_v1, %s1917_s23 }
  0x39   : > { %1077 = vrot.lane.b32.xlu0 %v1962_v3, %s1917_s23  ;;  %1073 = vrot.lane.b32.xlu1 %v1960_v2, %s1917_s23 }
  0x3d   : > { %934 = vrot.lane.b32.xlu0 %v1884_v4, %s1916_s22  ;;  %1220 = vrot.lane.b32.xlu1 %v1958_v1, %s1918_s24 }
  0x41   : > { %1222 = vrot.lane.b32.xlu0 %v1962_v3, %s1918_s24  ;;  %1218 = vrot.lane.b32.xlu1 %v1960_v2, %s1918_s24 }
  0x45   : > { %1079 = vrot.lane.b32.xlu0 %v1884_v4, %s1917_s23  ;;  %1224 = vrot.lane.b32.xlu1 %v1884_v4, %s1918_s24  ;;  %s2147_s23 = scalar_lea.vmem %s2167_s3, %s1859_s20 }
  0x49   : > { %1365 = vrot.lane.b32.xlu0 %v1958_v1, %s1919_s25  ;;  %1367 = vrot.lane.b32.xlu1 %v1962_v3, %s1919_s25 }
  0x4d   : > { %1363 = vrot.lane.b32.xlu0 %v1960_v2, %s1919_s25  ;;  %1369 = vrot.lane.b32.xlu1 %v1884_v4, %s1919_s25  ;;  %v1897_v4 = vld [vmem:[%s2165_s1 + $0x60] sm:$0xff]  }
  0x51   : > { %1504 = vperm.xlu0 %1877, %v1498_v12   ;;  %1509 = vperm.xlu1 %1878, %v1499_v13  }
  0x55   : > { %1514 = vperm.xlu1 %1878, %v1500_v18   ;;  %1519 = vperm.xlu0 %1877, %v1501_v19   ;;  %v1901_v18 = vld [vmem:[%s2165_s1 + $0x80] sm:$0xff]   ;;  %v1902_v19 = vld [vmem:[%s2165_s1 + $0x88] sm:$0xff]  }
  0x83   : > { %v241_v5 = vpop.permute.xlu0 %240  ;;  %v239_v6 = vpop.permute.xlu1 %238 }
  0x84   : > { %v247_v10 = vsel %vm246_vm0, %v239_v6, %v241_v5 }
  0x87   : > { %v243_v7 = vpop.permute.xlu0 %242  ;;  %v245_v8 = vpop.permute.xlu1 %244 }
  0x88   : > { %v248_v9 = vsel %vm246_vm0, %v241_v5, %v243_v7  ;;  %v249_v14 = vsel %vm246_vm0, %v243_v7, %v245_v8 }
  0x89   : > { %260 = vmatprep.subr.bf16.mxu1 %v248_v9 }
  0x8a   : > { %261 = vmatpush1.bf16.msra.mxu1 %v247_v10  ;;  %v1898_v10 = vld [vmem:[%s2165_s1 + $0x68] sm:$0xff]  }
  0x8b   : > { %v496_v15 = vpop.permute.xlu0 %495  ;;  %1709 = vmatprep.subr.bf16.mxu1 %v249_v14  ;;  %v498_v16 = vpop.permute.xlu1 %497 }
  0x8c   : > { %v503_v17 = vsel %vm501_vm1, %v496_v15, %v498_v16 }
  0x8d   : > { %1627 = vmatmul.mubr.msk.bf16.vlgmr.msra.gmra.mrb[0].mxu1 %vm253_vm2, %v1885_v11  ;;  %514 = vmatprep.subr.bf16.mxu0 %v503_v17 }
  0x8e   : > { %1710 = vmatpush3.bf16.msra.mxu1 %v249_v14  ;;  %302 = vmatprep.mubr.bf16.mxu1 %v1911_v0 }
  0x8f   : > { %v494_v20 = vpop.permute.xlu0 %493  ;;  %v641_v21 = vpop.permute.xlu1 %640  ;;  %381 = vmatprep.subr.bf16.mxu1 %v1958_v1 }
  0x90   : > { %v502_v22 = vsel %vm501_vm1, %v494_v20, %v496_v15  ;;  %v1900_v15 = vld [vmem:[%s2165_s1 + $0x78] sm:$0xff]  }
  0x91   : > { %515 = vmatpush1.bf16.msra.mxu0 %v502_v22 }
  0x93   : > { %v643_v25 = vpop.permute.xlu0 %642  ;;  %v639_v26 = vpop.permute.xlu1 %638 }
  0x94   : > { %v647_v27 = vsel %vm646_vm3, %v639_v26, %v641_v21  ;;  %1639 = vmatmul.mubr.msk.bf16.vlgmr.msra.gmra.mrb[0].mxu0 %vm253_vm2, %v2011_v23  ;;  %v648_v28 = vsel %vm646_vm3, %v641_v21, %v643_v25 }
  0x95   : > { %1628 = vmatmul.mubr.msk.bf16.gmra.mrb[4].mxu1 %vm253_vm2, %v1887_v24  ;;  %556 = vmatprep.mubr.bf16.mxu0 %v1911_v0 }
  0x96   : > { %659 = vmatprep.subr.bf16.mxu0 %v648_v28  ;;  %1711 = vmatprep.mubr.msk.bf16.mxu1 %vm253_vm2, %v1885_v11  ;;  %v1899_v11 = vld [vmem:[%s2165_s1 + $0x70] sm:$0xff]  }
  0x97   : > { %v786_v29 = vpop.permute.xlu0 %785  ;;  %v2023_v30 = vpop.permute.xlu1 %787  ;;  %660 = vmatpush1.bf16.msra.mxu0 %v647_v27 }
  0x98   : > { %v793_v32 = vsel %vm791_vm4, %v786_v29, %v2023_v30 }
  0x99   : > { %804 = vmatprep.subr.bf16.mxu0 %v793_v32 }
  0x9b   : > { %v784_v33 = vpop.permute.xlu0 %783  ;;  %v500_v34 = vpop.permute.xlu1 %499 }
  0x9c   : > { %1640 = vmatmul.mubr.msk.bf16.gmra.mrb[4].mxu0 %vm253_vm2, %v1888_v31  ;;  %v792_v38 = vsel %vm791_vm4, %v784_v33, %v786_v29  ;;  %v504_v42 = vsel %vm501_vm1, %v498_v16, %v500_v34 }
  0x9d   : > { %1712 = vmatmul.mubr.msk.bf16.vlgmr.msra.gmra.mrb[8].mxu1 %vm253_vm2, %v1887_v24  ;;  %691 = vmatprep.mubr.bf16.mxu0 %v1911_v0 }
  0x9e   : > { %382 = vmatpush1.bf16.msra.mxu1 %v1960_v2  ;;  %413 = vmatprep.mubr.bf16.mxu1 %v1911_v0 }
  0x9f   : > { %1715 = vmatprep.subr.bf16.mxu1 %v1962_v3  ;;  %v645_v35 = vpop.permute.xlu0 %644  ;;  %v931_v40 = vpop.permute.xlu1 %930 }
  0xa0   : > { %v649_v52 = vsel %vm646_vm3, %v643_v25, %v645_v35 }
  0xa3   : > { %v2044_v39 = vpop.permute.xlu0 %932  ;;  %v929_v47 = vpop.permute.xlu1 %928 }
  0xa4   : > { %1645 = vmatmul.mubr.msk.bf16.vlgmr.msra.gmra.mrb[0].mxu0 %vm253_vm2, %v1889_v36  ;;  %v938_v41 = vsel %vm936_vm5, %v931_v40, %v2044_v39  ;;  %v937_v48 = vsel %vm936_vm5, %v929_v47, %v931_v40 }
  0xa5   : > { %1633 = vmatmul.mubr.msk.bf16.vlgmr.msra.gmra.mrb[0].mxu1 %vm253_vm2, %v1890_v37  ;;  %701 = vmatprep.mubr.bf16.mxu0 %v1911_v0 }
  0xa6   : > { %1716 = vmatpush3.bf16.msra.mxu1 %v1962_v3  ;;  %423 = vmatprep.mubr.bf16.mxu1 %v1911_v0 }
  0xa7   : > { %1721 = vmatprep.subr.bf16.mxu1 %v504_v42  ;;  %805 = vmatpush1.bf16.msra.mxu0 %v792_v38  ;;  %v790_v45 = vpop.permute.xlu0 %789  ;;  %v1076_v50 = vpop.permute.xlu1 %1075 }
  0xa8   : > { %949 = vmatprep.subr.bf16.mxu0 %v938_v41  ;;  %v794_v57 = vsel %vm791_vm4, %v2023_v30, %v790_v45 }
  0xab   : > { %v1078_v49 = vpop.permute.xlu0 %1077  ;;  %v1074_v55 = vpop.permute.xlu1 %1073 }
  0xac   : > { %1646 = vmatmul.mubr.msk.bf16.gmra.mrb[4].mxu0 %vm253_vm2, %v1891_v43  ;;  %v1083_v51 = vsel %vm1081_vm6, %v1076_v50, %v1078_v49  ;;  %v1082_v59 = vsel %vm1081_vm6, %v1074_v55, %v1076_v50 }
  0xad   : > { %1634 = vmatmul.mubr.msk.bf16.gmra.mrb[4].mxu1 %vm253_vm2, %v1892_v44  ;;  %836 = vmatprep.mubr.bf16.mxu0 %v1911_v0 }
  0xae   : > { %1717 = vmatprep.mubr.msk.bf16.mxu1 %vm253_vm2, %v1890_v37 }
  0xaf   : > { %v935_v54 = vpop.permute.xlu0 %934  ;;  %v1221_v60 = vpop.permute.xlu1 %1220 }
  0xb0   : > { %v939_v3 = vsel %vm936_vm5, %v2044_v39, %v935_v54 }
  0xb3   : > { %v1223_v58 = vpop.permute.xlu0 %1222  ;;  %v1219_v63 = vpop.permute.xlu1 %1218 }
  0xb4   : > { %1651 = vmatmul.mubr.msk.bf16.vlgmr.msra.gmra.mrb[0].mxu0 %vm253_vm2, %v1893_v46  ;;  %v1228_v61 = vsel %vm1226_vm7, %v1221_v60, %v1223_v58  ;;  %v1227_v6 = vsel %vm1226_vm7, %v1219_v63, %v1221_v60 }
  0xb5   : > { %1718 = vmatmul.mubr.msk.bf16.vlgmr.msra.gmra.mrb[8].mxu1 %vm253_vm2, %v1892_v44  ;;  %846 = vmatprep.mubr.bf16.mxu0 %v1911_v0 }
  0xb6   : > { %1722 = vmatpush3.bf16.msra.mxu1 %v504_v42  ;;  %950 = vmatpush1.bf16.msra.mxu0 %v937_v48 }
  0xb7   : > { %1727 = vmatprep.subr.bf16.mxu1 %v649_v52  ;;  %1723 = vmatprep.mubr.msk.bf16.mxu1 %vm253_vm2, %v2011_v23  ;;  %v1225_v1 = vpop.permute.xlu1 %1224  ;;  %v1080_v2 = vpop.permute.xlu0 %1079 }
  0xb8   : > { %1094 = vmatprep.subr.bf16.mxu0 %v1083_v51  ;;  %v1084_v9 = vsel %vm1081_vm6, %v1078_v49, %v1080_v2  ;;  %v1229_v14 = vsel %vm1226_vm7, %v1223_v58, %v1225_v1 }
  0xbb   : > { %v1368_v5 = vpop.permute.xlu1 %1367  ;;  %v1366_v7 = vpop.permute.xlu0 %1365 }
  0xbc   : > { %1652 = vmatmul.mubr.msk.bf16.gmra.mrb[4].mxu0 %vm253_vm2, %v1894_v53  ;;  %v1373_v8 = vsel %vm1371_vm8, %v1366_v7, %v1368_v5 }
  0xbd   : > { %981 = vmatprep.mubr.bf16.mxu0 %v1911_v0 }
  0xbf   : > { %v1364_v12 = vpop.permute.xlu0 %1363  ;;  %v1370_v16 = vpop.permute.xlu1 %1369 }
  0xc0   : > { %v1372_v13 = vsel %vm1371_vm8, %v1364_v12, %v1366_v7  ;;  %v1374_v17 = vsel %vm1371_vm8, %v1368_v5, %v1370_v16 }
  0xc1   : > { %1724 = vmatmul.mubr.msk.bf16.vlgmr.msra.gmra.mrb[8].mxu1 %vm253_vm2, %v1888_v31 }
  0xc2   : > { %1728 = vmatpush3.bf16.msra.mxu1 %v649_v52  ;;  %1729 = vmatprep.mubr.msk.bf16.mxu1 %vm253_vm2, %v1889_v36 }
  0xc3   : > { %1733 = vmatprep.subr.bf16.mxu1 %v794_v57 }
  0xc4   : > { %1657 = vmatmul.mubr.msk.bf16.vlgmr.msra.gmra.mrb[0].mxu0 %vm253_vm2, %v1895_v56 }
  0xc5   : > { %991 = vmatprep.mubr.bf16.mxu0 %v1911_v0  ;;  %1095 = vmatpush1.bf16.msra.mxu0 %v1082_v59 }
  0xc6   : > { %1239 = vmatprep.subr.bf16.mxu0 %v1228_v61 }
  0xcc   : > { %1658 = vmatmul.mubr.msk.bf16.gmra.mrb[4].mxu0 %vm253_vm2, %v1896_v62 }
  0xcd   : > { %1730 = vmatmul.mubr.msk.bf16.vlgmr.msra.gmra.mrb[8].mxu1 %vm253_vm2, %v1891_v43  ;;  %1126 = vmatprep.mubr.bf16.mxu0 %v1911_v0 }
  0xce   : > { %1734 = vmatpush3.bf16.msra.mxu1 %v794_v57  ;;  %1735 = vmatprep.mubr.msk.bf16.mxu1 %vm253_vm2, %v1893_v46 }
  0xcf   : > { %1739 = vmatprep.subr.bf16.mxu1 %v939_v3 }
  0xd0   : > { %v1505_v28 = vpop.permute.xlu0 %1504  ;;  %v1510_v33 = vpop.permute.xlu1 %1509 }
  0xd4   : > { %1663 = vmatmul.mubr.msk.bf16.vlgmr.msra.gmra.mrb[0].mxu0 %vm253_vm2, %v1897_v4  ;;  %v1515_v46 = vpop.permute.xlu1 %1514  ;;  %v1520_v51 = vpop.permute.xlu0 %1519 }
  0xd5   : > { %1136 = vmatprep.mubr.bf16.mxu0 %v1911_v0  ;;  %1240 = vmatpush1.bf16.msra.mxu0 %v1227_v6 }
  0xd6   : > { %1384 = vmatprep.subr.bf16.mxu0 %v1373_v8 }
  0xd9   : > { %1736 = vmatmul.mubr.msk.bf16.vlgmr.msra.gmra.mrb[8].mxu1 %vm253_vm2, %v1894_v53 }
  0xda   : > { %1740 = vmatpush3.bf16.msra.mxu1 %v939_v3  ;;  %1741 = vmatprep.mubr.msk.bf16.mxu1 %vm253_vm2, %v1895_v56 }
  0xdb   : > { %1745 = vmatprep.subr.bf16.mxu1 %v1084_v9 }
  0xdc   : > { %1664 = vmatmul.mubr.msk.bf16.gmra.mrb[4].mxu0 %vm253_vm2, %v1898_v10 }
  0xdd   : > { %1271 = vmatprep.mubr.bf16.mxu0 %v1911_v0 }
  0xe4   : > { %1669 = vmatmul.mubr.msk.bf16.vlgmr.msra.gmra.mrb[0].mxu0 %vm253_vm2, %v1899_v11 }
  0xe5   : > { %1742 = vmatmul.mubr.msk.bf16.vlgmr.msra.gmra.mrb[8].mxu1 %vm253_vm2, %v1896_v62  ;;  %1281 = vmatprep.mubr.bf16.mxu0 %v1911_v0 }
  0xe6   : > { %1746 = vmatpush3.bf16.msra.mxu1 %v1084_v9  ;;  %1385 = vmatpush1.bf16.msra.mxu0 %v1372_v13 }
  0xe7   : > { %1751 = vmatprep.subr.bf16.mxu1 %v1229_v14  ;;  %1747 = vmatprep.mubr.msk.bf16.mxu1 %vm253_vm2, %v1897_v4 }
  0xec   : > { %1670 = vmatmul.mubr.msk.bf16.gmra.mrb[4].mxu0 %vm253_vm2, %v1900_v15 }
  0xed   : > { %1416 = vmatprep.mubr.bf16.mxu0 %v1911_v0 }
  0xf1   : > { %1748 = vmatmul.mubr.msk.bf16.vlgmr.msra.gmra.mrb[8].mxu1 %vm253_vm2, %v1898_v10 }
  0xf2   : > { %1752 = vmatpush3.bf16.msra.mxu1 %v1229_v14  ;;  %1753 = vmatprep.mubr.msk.bf16.mxu1 %vm253_vm2, %v1899_v11 }
  0xf3   : > { %1757 = vmatprep.subr.bf16.mxu1 %v1374_v17 }
  0xf4   : > { %1675 = vmatmul.mubr.msk.bf16.vlgmr.msra.gmra.mrb[0].mxu0 %vm253_vm2, %v1901_v18 }
  0xf5   : > { %1426 = vmatprep.mubr.bf16.mxu0 %v1911_v0 }
  0xfc   : > { %1676 = vmatmul.mubr.msk.bf16.gmra.mrb[4].mxu0 %vm253_vm2, %v1902_v19 }
  0xfd   : > { %1754 = vmatmul.mubr.msk.bf16.vlgmr.msra.gmra.mrb[8].mxu1 %vm253_vm2, %v1900_v15 }
  0xfe   : > { %1758 = vmatpush3.bf16.msra.mxu1 %v1374_v17  ;;  %1759 = vmatprep.mubr.msk.bf16.mxu1 %vm253_vm2, %v1901_v18 }
 0x109   : > { %1760 = vmatmul.mubr.msk.bf16.vlgmr.msra.gmra.mrb[8].mxu1 %vm253_vm2, %v1902_v19 }
 0x178   : > { %v415_v20 = vpop.f32.mrb[0].mxu1 }
 0x179   : > { %v417_v21 = vpop.f32.mrb[1].mxu1 }
 0x17a   : > { %v419_v22 = vpop.f32.mrb[2].mxu1 }
 0x17b   : > { %v421_v23 = vpop.f32.mrb[3].mxu1 }
 0x180   : > { %v425_v24 = vpop.f32.mrb[4].mxu1 }
 0x181   : > { %v427_v0 = vpop.f32.mrb[5].mxu1 }
 0x182   : > { %v429_v25 = vpop.f32.mrb[6].mxu1 }
 0x183   : > { %v431_v26 = vpop.f32.mrb[7].mxu1 }
 0x1c7   : > { %v1418_v27 = vpop.f32.mrb[0].mxu0 }
 0x1c8   : > { %v1763_v29 = vadd.f32 %v1418_v27, %v415_v20  ;;  %v1420_v30 = vpop.f32.mrb[1].mxu0 }
 0x1c9   : > { %v1764_v31 = vadd.f32 %v1420_v30, %v417_v21  ;;  %v1422_v32 = vpop.f32.mrb[2].mxu0 }
 0x1ca   : > { %v1522_v34 = vadd.f32 %v1763_v29, %v1505_v28  ;;  %v1765_v35 = vadd.f32 %v1422_v32, %v419_v22  ;;  %v1424_v36 = vpop.f32.mrb[3].mxu0 }
 0x1cb   : > { %v1523_v37 = vadd.f32 %v1764_v31, %v1505_v28  ;;  %v1766_v38 = vadd.f32 %v1424_v36, %v421_v23 }
 0x1cc   : > { %v1534_v39 = vmax.f32 %v1522_v34, 0.0  ;;  %v1525_v40 = vadd.f32 %v1765_v35, %v1510_v33 }
 0x1cd   : > { %v1535_v41 = vmax.f32 %v1523_v37, 0.0  ;;  %v1526_v42 = vadd.f32 %v1766_v38, %v1510_v33 }
 0x1ce   : > { %1546 = vst [vmem:[%s2147_s23] sm:$0xff] %v1534_v39  ;;  %v1537_v43 = vmax.f32 %v1525_v40, 0.0 }
 0x1cf   : > { %1547 = vst [vmem:[%s2147_s23 + $0x8] sm:$0xff] %v1535_v41  ;;  %v1538_v44 = vmax.f32 %v1526_v42, 0.0  ;;  %v1428_v45 = vpop.f32.mrb[4].mxu0 }
 0x1d0   : > { %1549 = vst [vmem:[%s2147_s23 + $0x18] sm:$0xff] %v1537_v43  ;;  %v1767_v47 = vadd.f32 %v1428_v45, %v425_v24  ;;  %v1430_v48 = vpop.f32.mrb[5].mxu0 }
 0x1d1   : > { %1550 = vst [vmem:[%s2147_s23 + $0x20] sm:$0xff] %v1538_v44  ;;  %v1768_v49 = vadd.f32 %v1430_v48, %v427_v0  ;;  %v1432_v50 = vpop.f32.mrb[6].mxu0 }
 0x1d2   : > { %v1769_v52 = vadd.f32 %v1432_v50, %v429_v25  ;;  %v1528_v53 = vadd.f32 %v1767_v47, %v1515_v46  ;;  %v1434_v54 = vpop.f32.mrb[7].mxu0 }
 0x1d3   : > { %v1529_v55 = vadd.f32 %v1768_v49, %v1515_v46  ;;  %v1770_v56 = vadd.f32 %v1434_v54, %v431_v26 }
 0x1d4   : > { %v1540_v57 = vmax.f32 %v1528_v53, 0.0  ;;  %v1531_v58 = vadd.f32 %v1769_v52, %v1520_v51 }
 0x1d5   : > { %v1541_v59 = vmax.f32 %v1529_v55, 0.0  ;;  %v1532_v60 = vadd.f32 %v1770_v56, %v1520_v51 }
 0x1d6   : > { %1552 = vst [vmem:[%s2147_s23 + $0x30] sm:$0xff] %v1540_v57  ;;  %v1543_v61 = vmax.f32 %v1531_v58, 0.0 }
 0x1d7   : > { %1553 = vst [vmem:[%s2147_s23 + $0x38] sm:$0xff] %v1541_v59  ;;  %v1544_v62 = vmax.f32 %v1532_v60, 0.0 }
 0x1d8   : > { %1555 = vst [vmem:[%s2147_s23 + $0x48] sm:$0xff] %v1543_v61 }
 0x1d9   : > { %1556 = vst [vmem:[%s2147_s23 + $0x50] sm:$0xff] %v1544_v62 }
 0x1dc   : > { %v1761_v63 = vpop.f32.mrb[8].mxu1 }
 0x1dd   : > { %v1530_v1 = vadd.f32 %v1761_v63, %v1515_v46  ;;  %v1471_v2 = vpop.f32.mrb[9].mxu1 }
 0x1de   : > { %v1524_v3 = vadd.f32 %v1505_v28, %v1471_v2  ;;  %v1762_v4 = vpop.f32.mrb[10].mxu1 }
 0x1df   : > { %v1542_v5 = vmax.f32 %v1530_v1, 0.0  ;;  %v1533_v6 = vadd.f32 %v1762_v4, %v1520_v51  ;;  %v1474_v7 = vpop.f32.mrb[11].mxu1 }
 0x1e0   : > { %v1536_v8 = vmax.f32 %v1524_v3, 0.0  ;;  %v1527_v9 = vadd.f32 %v1510_v33, %v1474_v7 }
 0x1e1   : > { %1554 = vst [vmem:[%s2147_s23 + $0x40] sm:$0xff] %v1542_v5  ;;  %v1545_v10 = vmax.f32 %v1533_v6, 0.0 }
 0x1e2   : > { %1548 = vst [vmem:[%s2147_s23 + $0x10] sm:$0xff] %v1536_v8  ;;  %v1539_v11 = vmax.f32 %v1527_v9, 0.0 }
 0x1e3   : > { %1557 = vst [vmem:[%s2147_s23 + $0x58] sm:$0xff] %v1545_v10 }
 0x1e4   : > { %1551 = vst [vmem:[%s2147_s23 + $0x28] sm:$0xff] %v1539_v11 }
 0x1e5 PF: > { %s13_s12 = sadd.s32 1, %s1909_s12  }
 0x1e6   : > { %p10_p4 = scmp.ge.s32.totalorder %s13_s12, 4  }
 0x1e8   :  { %12 = sbr.rel (!%p10_p4) target bundleno = 1 (0x1), region = 62 }

</bundles_post_ra>
